<compile_context>
chip_gen: v7x
topology: tpu7x:2x2x1
jax: 0.10.0
libtpu: 0.0.40
codegen_flags: <defaults>
</compile_context>

<pallas_src>
import functools

import jax
import jax.numpy as jnp
from jax.experimental import pallas as pl
from jax.experimental.pallas import tpu as pltpu


def _pool_proj_kernel(f_ref, w_ref, b_ref, o_ref, acc_ref, *, hw_total, hw_tile):
    """Fused global-average-pool + linear projection, gridded over (B, HW).

    f_ref:   (b_tile, hw_tile, C) bf16  feature tile (channels-last, lane-dense)
    w_ref:   (C, D)               bf16  projection weight.T pre-scaled by 1/HW
    b_ref:   (1, D)               f32   projection bias
    o_ref:   (b_tile, D)          f32   encoder output tile
    acc_ref: (b_tile, C)          f32   spatial-sum accumulator (VMEM scratch)
    """
    hw_idx = pl.program_id(1)
    n_hw = pl.num_programs(1)

    @pl.when(hw_idx == 0)
    def _():
        acc_ref[...] = jnp.zeros_like(acc_ref)

    rem = hw_total % hw_tile  # static Python int
    if rem == 0:
        # Exact tiling: steady-state loop is a plain bf16 read + f32 accumulate.
        acc_ref[...] += jnp.sum(f_ref[...].astype(jnp.float32), axis=1)
    else:
        # Only the ragged last hw step pays for the mask.
        @pl.when(hw_idx < n_hw - 1)
        def _():
            acc_ref[...] += jnp.sum(f_ref[...].astype(jnp.float32), axis=1)

        @pl.when(hw_idx == n_hw - 1)
        def _():
            f = f_ref[...].astype(jnp.float32)                       # (b, hw, C)
            row = jax.lax.broadcasted_iota(jnp.int32, (1, hw_tile, 1), 1)
            f = jnp.where(row < rem, f, 0.0)                         # mask pad rows
            acc_ref[...] += jnp.sum(f, axis=1)

    @pl.when(hw_idx == n_hw - 1)
    def _():
        # 1/HW is folded into w_ref, so the pooled sum goes straight to the MXU
        # as bf16 with f32 accumulation.  nn.Linear: pooled @ W.T + b.
        pooled = acc_ref[...].astype(jnp.bfloat16)                   # (b_tile, C)
        o_ref[...] = (
            jnp.dot(pooled, w_ref[...], preferred_element_type=jnp.float32)
            + b_ref[...]
        )


def image_encoder_forward(features_nhwc, proj_w_t, proj_b, *,
                          b_tile=128, hw_tile=None,
                          feat_tile_bytes=14 * 1024 * 1024):
    """features_nhwc: (B, H, W, 1024) bf16 backbone output (channels-last).
    proj_w_t: (1024, 512) f32  -- nn.Linear(1024, 512).weight.T, pre-transposed once.
    proj_b:   (512,)      f32  -- nn.Linear bias.
    """
    B, H, W, C = features_nhwc.shape
    D = proj_w_t.shape[1]
    HW = H * W
    # Free reshape (merges adjacent dims, no relayout): NHWC -> (B, HW, C).
    f = features_nhwc.reshape(B, HW, C)

    # One-time-per-call param prep (tiny vs. the backbone; XLA fuses/hoists it):
    # fold the AdaptiveAvgPool 1/HW scale into the weight and cast to bf16.
    w_bf16 = (proj_w_t * (1.0 / HW)).astype(jnp.bfloat16)            # (C, D)
    b_2d = proj_b.reshape(1, D).astype(jnp.float32)                  # (1, D)

    # ---- batch tiling -------------------------------------------------------
    b_tile = min(b_tile, B)
    # v7x megacore: keep >=2 tiles on the "parallel" batch axis when the batch is
    # big enough to split into sublane(8)-aligned tiles.
    if B >= 16 and pl.cdiv(B, b_tile) < 2:
        b_tile = ((pl.cdiv(B, 2) + 7) // 8) * 8
    # Partial-batch blocks must keep the second-to-last (sublane) dim 8-aligned;
    # a full-batch block may be any size.
    if b_tile != B and b_tile % 8 != 0:
        b_tile = min(B, max(8, (b_tile // 8) * 8))

    # ---- spatial tiling -----------------------------------------------------
    if hw_tile is None:
        # Per-pipeline-buffer bf16 feature budget.  Real DenseNet-121 heads
        # (HW <= 49) fit in a single step even at b_tile=128 (degenerate hw axis);
        # larger maps stream in 8-aligned chunks (double-buffered, fits v7x VMEM).
        rows = max(8, feat_tile_bytes // (b_tile * C * 2))
        hw_tile = HW if HW <= rows else (rows // 8) * 8
    else:
        hw_tile = min(hw_tile, HW)

    grid = (pl.cdiv(B, b_tile), pl.cdiv(HW, hw_tile))

    # ---- VMEM budget (double-buffered feature tile + resident weight/bias etc.)
    feat_buf = b_tile * hw_tile * C * 2
    need = (2 * feat_buf            # feature double buffer (bf16)
            + 2 * C * D * 2         # weight (bf16, default double-buffered)
            + 2 * b_tile * D * 4    # output tiles
            + b_tile * C * 4        # f32 accumulator scratch
            + (2 << 20))            # headroom
    vmem_limit = max(32 * 1024 * 1024, need)

    kernel = functools.partial(_pool_proj_kernel, hw_total=HW, hw_tile=hw_tile)

    return pl.pallas_call(
        kernel,
        out_shape=jax.ShapeDtypeStruct((B, D), jnp.float32),
        grid_spec=pltpu.PrefetchScalarGridSpec(
            num_scalar_prefetch=0,
            grid=grid,
            in_specs=[
                # Feature tile streams along the HW (reduction) axis; the 1024
                # channels stay full-width on the lane axis (unmasked vld).
                pl.BlockSpec((b_tile, hw_tile, C), lambda b, h: (b, h, 0)),
                # Weight / bias stay resident across the whole grid.
                pl.BlockSpec((C, D), lambda b, h: (0, 0)),
                pl.BlockSpec((1, D), lambda b, h: (0, 0)),
            ],
            out_specs=pl.BlockSpec((b_tile, D), lambda b, h: (b, 0)),
            scratch_shapes=[pltpu.VMEM((b_tile, C), jnp.float32)],
        ),
        compiler_params=pltpu.CompilerParams(
            # Batch tiles are independent (megacore); HW axis is a reduction.
            dimension_semantics=("parallel", "arbitrary"),
            vmem_limit_bytes=int(vmem_limit),
        ),
    )(f, w_bf16, b_2d)


if __name__ == "__main__":
    key = jax.random.PRNGKey(0)
    k_feat, k_w, k_b = jax.random.split(key, 3)

    # densenet121.features output has 1024 channels; a 128x128 input image gives a
    # 4x4 spatial map.  Batch = 2.  Backbone output is taken channels-last (NHWC).
    B, H, W, C = 2, 4, 4, 1024
    D_out = 512

    features = jax.random.normal(
        k_feat, (B, H, W, C), dtype=jnp.float32).astype(jnp.bfloat16)
    proj_w = 0.02 * jax.random.normal(k_w, (D_out, C), dtype=jnp.float32)  # (512, 1024)
    proj_b = 0.01 * jax.random.normal(k_b, (D_out,), dtype=jnp.float32)    # (512,)

    # One-time parameter prep, outside the per-call path.
    proj_w_t = jnp.transpose(proj_w)        # (1024, 512)

    out = image_encoder_forward(features, proj_w_t, proj_b)
    out = jax.block_until_ready(out)

    # Pure-JAX reference (module semantics: pool in f32, f32 linear) for correctness.
    f32 = features.astype(jnp.float32)
    pooled_ref = jnp.mean(f32.reshape(B, H * W, C), axis=1)   # (B, 1024)
    ref = pooled_ref @ proj_w_t + proj_b.reshape(1, D_out)    # (B, 512)

    assert out.shape == (B, D_out), out.shape
    max_err = float(jnp.max(jnp.abs(out - ref)))
    assert jnp.allclose(out, ref, atol=1e-2, rtol=1e-2), max_err

    print("KERNEL_OK")
</pallas_src>

<mosaic_0001>
module attributes {stable_mosaic.version = 11 : i64} {
  func.func @_pool_proj_kernel(%arg0: i32, %arg1: i32, %arg2: memref<2x16x1024xbf16, #tpu.memory_space<vmem>>, %arg3: memref<1024x512xbf16, #tpu.memory_space<vmem>>, %arg4: memref<1x512xf32, #tpu.memory_space<vmem>>, %arg5: memref<2x512xf32, #tpu.memory_space<vmem>>, %arg6: memref<2x1024xf32, #tpu.memory_space<vmem>>) attributes {dimension_semantics = [#tpu.dimension_semantics<parallel>, #tpu.dimension_semantics<arbitrary>], iteration_bounds = array<i64: 1, 1>, scalar_prefetch = 0 : i64, scratch_operands = 1 : i64, tpu.core_type = #tpu.core_type<tc>, window_params = [{transform_indices = @transform_0, window_bounds = array<i64: 2, 16, 1024>}, {pipeline_mode = #tpu.pipeline_mode<synchronous>, transform_indices = @transform_1, window_bounds = array<i64: 1024, 512>}, {pipeline_mode = #tpu.pipeline_mode<synchronous>, transform_indices = @transform_2, window_bounds = array<i64: 1, 512>}, {transform_indices = @transform_3, window_bounds = array<i64: 2, 512>}]} {
    %c0_i32 = arith.constant 0 : i32
    %0 = arith.cmpi eq, %arg1, %c0_i32 : i32
    %1 = arith.extui %0 : i1 to i32
    %c0_i32_0 = arith.constant 0 : i32
    %2 = arith.cmpi ne, %1, %c0_i32_0 : i32
    scf.if %2 {
      %cst_9 = arith.constant 0.000000e+00 : f32
      %12 = vector.broadcast %cst_9 : f32 to vector<2x1024xf32>
      %c0_10 = arith.constant 0 : index
      %c0_11 = arith.constant 0 : index
      %13 = vector.load %arg6[%c0_10, %c0_11] : memref<2x1024xf32, #tpu.memory_space<vmem>>, vector<2x1024xf32>
      tpu.vector_store %arg6[%c0_10, %c0_11], %12 {strides = array<i32>} : memref<2x1024xf32, #tpu.memory_space<vmem>>, vector<2x1024xf32>,
    } else {
    }
    %c0 = arith.constant 0 : index
    %c0_1 = arith.constant 0 : index
    %3 = vector.load %arg6[%c0, %c0_1] : memref<2x1024xf32, #tpu.memory_space<vmem>>, vector<2x1024xf32>
    %c0_2 = arith.constant 0 : index
    %c0_3 = arith.constant 0 : index
    %c0_4 = arith.constant 0 : index
    %4 = vector.load %arg2[%c0_2, %c0_3, %c0_4] : memref<2x16x1024xbf16, #tpu.memory_space<vmem>>, vector<2x16x1024xbf16>
    %5 = arith.extf %4 : vector<2x16x1024xbf16> to vector<2x16x1024xf32>
    %cst = arith.constant dense<0.000000e+00> : vector<2x1024xf32>
    %6 = vector.multi_reduction <add>, %5, %cst [1] : vector<2x16x1024xf32> to vector<2x1024xf32>
    %7 = arith.addf %3, %6 : vector<2x1024xf32>
    %c0_5 = arith.constant 0 : index
    %c0_6 = arith.constant 0 : index
    %8 = vector.load %arg6[%c0_5, %c0_6] : memref<2x1024xf32, #tpu.memory_space<vmem>>, vector<2x1024xf32>
    tpu.vector_store %arg6[%c0_5, %c0_6], %7 {strides = array<i32>} : memref<2x1024xf32, #tpu.memory_space<vmem>>, vector<2x1024xf32>,
    %c0_i32_7 = arith.constant 0 : i32
    %9 = arith.cmpi eq, %arg1, %c0_i32_7 : i32
    %10 = arith.extui %9 : i1 to i32
    %c0_i32_8 = arith.constant 0 : i32
    %11 = arith.cmpi ne, %10, %c0_i32_8 : i32
    scf.if %11 {
      %c0_9 = arith.constant 0 : index
      %c0_10 = arith.constant 0 : index
      %12 = vector.load %arg6[%c0_9, %c0_10] : memref<2x1024xf32, #tpu.memory_space<vmem>>, vector<2x1024xf32>
      %13 = arith.truncf %12 : vector<2x1024xf32> to vector<2x1024xbf16>
      %c0_11 = arith.constant 0 : index
      %c0_12 = arith.constant 0 : index
      %14 = vector.load %arg3[%c0_11, %c0_12] : memref<1024x512xbf16, #tpu.memory_space<vmem>>, vector<1024x512xbf16>
      %cst_13 = arith.constant dense<0.000000e+00> : vector<2x512xf32>
      %15 = tpu.matmul %13, %14, %cst_13 {dimension_numbers = #tpu.dot_dimension_numbers<[1], [0], [0], [1], [0, 0, 1, 1], [], []>} : vector<2x1024xbf16>, vector<1024x512xbf16>, vector<2x512xf32> -> vector<2x512xf32>
      %c0_14 = arith.constant 0 : index
      %c0_15 = arith.constant 0 : index
      %16 = vector.load %arg4[%c0_14, %c0_15] : memref<1x512xf32, #tpu.memory_space<vmem>>, vector<1x512xf32>
      %17 = vector.broadcast %16 : vector<1x512xf32> to vector<2x512xf32>
      %18 = arith.addf %15, %17 : vector<2x512xf32>
      %c0_16 = arith.constant 0 : index
      %c0_17 = arith.constant 0 : index
      %19 = vector.load %arg5[%c0_16, %c0_17] : memref<2x512xf32, #tpu.memory_space<vmem>>, vector<2x512xf32>
      tpu.vector_store %arg5[%c0_16, %c0_17], %18 {strides = array<i32>} : memref<2x512xf32, #tpu.memory_space<vmem>>, vector<2x512xf32>,
    } else {
    }
    return
  }
  func.func @transform_0(%arg0: i32, %arg1: i32) -> (i32, i32, i32) {
    %c0_i32 = arith.constant 0 : i32
    %c0_i32_0 = arith.constant 0 : i32
    return %arg0, %arg1, %c0_i32 : i32, i32, i32
  }
  func.func @transform_1(%arg0: i32, %arg1: i32) -> (i32, i32) {
    %c0_i32 = arith.constant 0 : i32
    %c0_i32_0 = arith.constant 0 : i32
    %c0_i32_1 = arith.constant 0 : i32
    return %c0_i32, %c0_i32_0 : i32, i32
  }
  func.func @transform_2(%arg0: i32, %arg1: i32) -> (i32, i32) {
    %c0_i32 = arith.constant 0 : i32
    %c0_i32_0 = arith.constant 0 : i32
    %c0_i32_1 = arith.constant 0 : i32
    return %c0_i32, %c0_i32_0 : i32, i32
  }
  func.func @transform_3(%arg0: i32, %arg1: i32) -> (i32, i32) {
    %c0_i32 = arith.constant 0 : i32
    %c0_i32_0 = arith.constant 0 : i32
    return %arg0, %c0_i32 : i32, i32
  }
}

</mosaic_0001>

<bundles_post_ra>
// kernel: tpu_custom_call.1
= control target key start
LH: loop header
LB: loop body
LE: loop exit
PB: predicated region body
PF: predicated region fallthrough
CT: control target
= control target key end

     0   :  { %8 = vsyncpa [#allocation4], 0  ;;  %s3176_s0 = inlined_call_operand.hbm [shape: bf16[2,16,1024], index: 0, kind: input, shape index: {}]   ;;  %s3177_s1 = inlined_call_operand.hbm [shape: bf16[1024,512], index: 1, kind: input, shape index: {}]   ;;  %s3178_s2 = inlined_call_operand.vmem [shape: f32[1,512], index: 2, kind: input, shape index: {}]   ;;  %s3179_s3 = inlined_call_operand.hbm [shape: f32[2,512], index: 3, kind: output, shape index: {}]  }
   0x1   :  { %9 = vsyncpa [#allocation7], 0 }
   0x2   :  { %10 = vsyncpa [#allocation5], 0  ;;  %s3051_s12 = smov [#allocation3]   ;;  %s2979_s16 = scalar_lea.hbm %s3176_s0, 2048 }
   0x3   :  { %s16_s13 = sshll.u32 %s3051_s12, 4  ;;  %p2980_p0 = scmp.ne.s32.totalorder %s3176_s0, %s2979_s16  ;;  %s17_s13 = int_to_ptr.vmem [resolvable:$true] %s16_s13 }
   0x4   :  { %p2983_p1 = scmp.lt.u32.totalorder %s2979_s16, %s3176_s0 }
   0x6   :  { %p2985_p2 = pnand %p2983_p1, %p2980_p0 }
   0x8   :  { %2988 = shalt.err (!%p2985_p2)
}
   0x9   :  { %s2989_s21 = scalar_lea.vmem %s17_s13, 2048  ;;  %p2994_p4 = scmp.lt.s32.totalorder %s17_s13, %s17_s13 }
   0xa   :  { %p2990_p3 = scmp.ne.s32.totalorder %s17_s13, %s2989_s21  ;;  %p2995_p5 = scmp.lt.s32.totalorder %s2989_s21, %s2989_s21 }
   0xc   :  { %p2996_p6 = por %p2995_p5, %p2994_p4 }
   0xe   :  { %p2997_p7 = pnand %p2996_p6, %p2990_p3 }
  0x10   :  { %3000 = shalt.err (!%p2997_p7)
}
  0x11   :  { %s3052_s22 = smov 512   ;;  %s3053_s23 = smov 32  }
  0x12   :  { %22 = dma.hbm_to_vmem [thread:$0]  %s3176_s0, 2048, %s17_s13, [#allocation4], %s3052_s22, %s3052_s22, %s3053_s23  }
  0x13   :  { %s3054_s26 = smov [#allocation6]   ;;  %s3001_s30 = scalar_lea.hbm %s3177_s1, 32768 }
  0x14   :  { %s28_s27 = sshll.u32 %s3054_s26, 4  ;;  %p3002_p8 = scmp.ne.s32.totalorder %s3177_s1, %s3001_s30  ;;  %s29_s27 = int_to_ptr.vmem [resolvable:$true] %s28_s27 }
  0x15   :  { %p3005_p9 = scmp.lt.u32.totalorder %s3001_s30, %s3177_s1 }
  0x17   :  { %p3007_p10 = pnand %p3005_p9, %p3002_p8 }
  0x19   :  { %3010 = shalt.err (!%p3007_p10)
}
  0x1a   :  { %s3011_s8 = scalar_lea.vmem %s29_s27, 32768  ;;  %p3016_p12 = scmp.lt.s32.totalorder %s29_s27, %s29_s27 }
  0x1b   :  { %p3012_p11 = scmp.ne.s32.totalorder %s29_s27, %s3011_s8  ;;  %p3017_p13 = scmp.lt.s32.totalorder %s3011_s8, %s3011_s8 }
  0x1d   :  { %p3018_p0 = por %p3017_p13, %p3016_p12 }
  0x1f   :  { %p3019_p1 = pnand %p3018_p0, %p3012_p11 }
  0x21   :  { %3022 = shalt.err (!%p3019_p1)
}
  0x22   :  { %s3055_s0 = smov 256   ;;  %s3056_s9 = smov 16  }
  0x23   :  { %34 = dma.hbm_to_vmem [thread:$0]  %s3177_s1, 32768, %s29_s27, [#allocation7], %s3055_s0, %s3055_s0, %s3056_s9  }
  0x24   :  { %3045 = dma.done.wait [#allocation4], 2048  }
  0x25   :  { %3046 = vsyncadd [#allocation4], 4294965248 }
  0x26   :  { %3047 = dma.done.wait [#allocation7], 32768  }
  0x27   :  { %3048 = vsyncadd [#allocation7], 4294934528  ;;  %v2595_v0 = vld [vmem:[#allocation6 + $0x4] ss:$16 sps:$4 sm:$0xff]   ;;  %v2597_v1 = vld [vmem:[#allocation6 + $0xc] ss:$16 sps:$4 sm:$0xff]   ;;  %v232_v41 = vlaneseq }
  0x28   :  { %1936 = vmatprep.subr.bf16.mxu0 %v2595_v0  ;;  %v2599_v2 = vld [vmem:[#allocation6] ss:$16 sps:$4 sm:$0xff]   ;;  %v2600_v3 = vld [vmem:[#allocation6 + $0x8] ss:$16 sps:$4 sm:$0xff]   ;;  %2100 = vmatprep.subr.bf16.mxu1 %v2597_v1  ;;  %v2601_v4 = vld [vmem:[#allocation6 + $0x24] ss:$16 sps:$4 sm:$0xff]  }
  0x29   :  { %1937 = vmatpush1.bf16.msra.mxu0 %v2599_v2  ;;  %2101 = vmatpush1.bf16.msra.mxu1 %v2600_v3  ;;  %v2603_v5 = vld [vmem:[#allocation6 + $0x2c] ss:$16 sps:$4 sm:$0xff]   ;;  %v2605_v6 = vld [vmem:[#allocation6 + $0x20] ss:$16 sps:$4 sm:$0xff]   ;;  %v2606_v7 = vld [vmem:[#allocation6 + $0x28] ss:$16 sps:$4 sm:$0xff]  }
  0x2a   :  { %1938 = vmatprep.subr.bf16.mxu0 %v2601_v4  ;;  %2102 = vmatprep.subr.bf16.mxu1 %v2603_v5  ;;  %v2607_v8 = vld [vmem:[#allocation6 + $0x44] ss:$16 sps:$4 sm:$0xff]   ;;  %v2609_v9 = vld [vmem:[#allocation6 + $0x4c] ss:$16 sps:$4 sm:$0xff]   ;;  %v2611_v10 = vld [vmem:[#allocation6 + $0x40] ss:$16 sps:$4 sm:$0xff]  }
  0x2b   :  { %v2612_v11 = vld [vmem:[#allocation6 + $0x48] ss:$16 sps:$4 sm:$0xff]   ;;  %v2613_v12 = vld [vmem:[#allocation6 + $0x64] ss:$16 sps:$4 sm:$0xff]   ;;  %v2615_v13 = vld [vmem:[#allocation6 + $0x6c] ss:$16 sps:$4 sm:$0xff]  }
  0x2c   :  { %v2617_v14 = vld [vmem:[#allocation6 + $0x60] ss:$16 sps:$4 sm:$0xff]   ;;  %v2618_v15 = vld [vmem:[#allocation6 + $0x68] ss:$16 sps:$4 sm:$0xff]   ;;  %v2619_v16 = vld [vmem:[#allocation6 + $0x84] ss:$16 sps:$4 sm:$0xff]  }
  0x2d   :  { %1939 = vmatpush1.bf16.msra.mxu0 %v2605_v6  ;;  %2103 = vmatpush1.bf16.msra.mxu1 %v2606_v7  ;;  %v2621_v17 = vld [vmem:[#allocation6 + $0x8c] ss:$16 sps:$4 sm:$0xff]   ;;  %v2623_v18 = vld [vmem:[#allocation6 + $0x80] ss:$16 sps:$4 sm:$0xff]   ;;  %v2624_v19 = vld [vmem:[#allocation6 + $0x88] ss:$16 sps:$4 sm:$0xff]  }
  0x2e   :  { %1940 = vmatprep.subr.bf16.mxu0 %v2607_v8  ;;  %2104 = vmatprep.subr.bf16.mxu1 %v2609_v9  ;;  %v2625_v20 = vld [vmem:[#allocation6 + $0xa4] ss:$16 sps:$4 sm:$0xff]   ;;  %v2627_v21 = vld [vmem:[#allocation6 + $0xac] ss:$16 sps:$4 sm:$0xff]   ;;  %v2629_v22 = vld [vmem:[#allocation6 + $0xa0] ss:$16 sps:$4 sm:$0xff]  }
  0x2f   :  { %v2630_v23 = vld [vmem:[#allocation6 + $0xa8] ss:$16 sps:$4 sm:$0xff]   ;;  %v2631_v24 = vld [vmem:[#allocation6 + $0xc4] ss:$16 sps:$4 sm:$0xff]   ;;  %v2633_v25 = vld [vmem:[#allocation6 + $0xcc] ss:$16 sps:$4 sm:$0xff]  }
  0x30   :  { %v2635_v26 = vld [vmem:[#allocation6 + $0xc0] ss:$16 sps:$4 sm:$0xff]   ;;  %v2636_v27 = vld [vmem:[#allocation6 + $0xc8] ss:$16 sps:$4 sm:$0xff]   ;;  %v2637_v28 = vld [vmem:[#allocation6 + $0xe4] ss:$16 sps:$4 sm:$0xff]  }
  0x31   :  { %1941 = vmatpush1.bf16.msra.mxu0 %v2611_v10  ;;  %2105 = vmatpush1.bf16.msra.mxu1 %v2612_v11  ;;  %v2639_v29 = vld [vmem:[#allocation6 + $0xec] ss:$16 sps:$4 sm:$0xff]   ;;  %v2641_v30 = vld [vmem:[#allocation6 + $0xe0] ss:$16 sps:$4 sm:$0xff]   ;;  %v2642_v31 = vld [vmem:[#allocation6 + $0xe8] ss:$16 sps:$4 sm:$0xff]  }
  0x32   :  { %1942 = vmatprep.subr.bf16.mxu0 %v2613_v12  ;;  %2106 = vmatprep.subr.bf16.mxu1 %v2615_v13  ;;  %v2643_v32 = vld [vmem:[#allocation6 + $0x104] ss:$16 sps:$4 sm:$0xff]   ;;  %v2645_v33 = vld [vmem:[#allocation6 + $0x10c] ss:$16 sps:$4 sm:$0xff]   ;;  %v2647_v34 = vld [vmem:[#allocation6 + $0x100] ss:$16 sps:$4 sm:$0xff]  }
  0x33   :  { %v2648_v35 = vld [vmem:[#allocation6 + $0x108] ss:$16 sps:$4 sm:$0xff]   ;;  %v2649_v36 = vld [vmem:[#allocation6 + $0x124] ss:$16 sps:$4 sm:$0xff]   ;;  %v2651_v37 = vld [vmem:[#allocation6 + $0x12c] ss:$16 sps:$4 sm:$0xff]  }
  0x34   :  { %v2653_v38 = vld [vmem:[#allocation6 + $0x120] ss:$16 sps:$4 sm:$0xff]   ;;  %v3057_v39 = vmov 1983009808   ;;  %v2654_v42 = vld [vmem:[#allocation6 + $0x128] ss:$16 sps:$4 sm:$0xff]  }
  0x35   :  { %1943 = vmatpush1.bf16.msra.mxu0 %v2617_v14  ;;  %2107 = vmatpush1.bf16.msra.mxu1 %v2618_v15  ;;  %v230_v40 = vunpack.c.l.s4 %v3057_v39  ;;  %v2655_v43 = vld [vmem:[#allocation6 + $0x144] ss:$16 sps:$4 sm:$0xff]   ;;  %v2657_v44 = vld [vmem:[#allocation6 + $0x14c] ss:$16 sps:$4 sm:$0xff]   ;;  %v2659_v45 = vld [vmem:[#allocation6 + $0x140] ss:$16 sps:$4 sm:$0xff]  }
  0x36   :  { %1944 = vmatprep.subr.bf16.mxu0 %v2619_v16  ;;  %2108 = vmatprep.subr.bf16.mxu1 %v2621_v17  ;;  %v2660_v46 = vld [vmem:[#allocation6 + $0x148] ss:$16 sps:$4 sm:$0xff]   ;;  %v3103_v48 = vshrl.u32 %v232_v41, 7  ;;  %v2661_v49 = vld [vmem:[#allocation6 + $0x164] ss:$16 sps:$4 sm:$0xff]   ;;  %vm300_vm0 = vcmask 1041409  }
  0x37   :  { %v231_v47 = vunpack.c.0.s8 %v230_v40  ;;  %v2663_v50 = vld [vmem:[#allocation6 + $0x16c] ss:$16 sps:$4 sm:$0xff]   ;;  %v2665_v51 = vld [vmem:[#allocation6 + $0x160] ss:$16 sps:$4 sm:$0xff]   ;;  %v2666_v52 = vld [vmem:[#allocation6 + $0x168] ss:$16 sps:$4 sm:$0xff]  }
  0x38   :  { %v51_v53 = vld [vmem:[#allocation3] sm:$0xff]  ;;  %v2669_v55 = vld [vmem:[#allocation6 + $0x18c] ss:$16 sps:$4 sm:$0xff]   ;;  %v2672_v15 = vld [vmem:[#allocation6 + $0x188] ss:$16 sps:$4 sm:$0xff]   ;;  %vm302_vm1 = vcmask 1043459  }
  0x39   :  { %1945 = vmatpush1.bf16.msra.mxu0 %v2623_v18  ;;  %2109 = vmatpush1.bf16.msra.mxu1 %v2624_v19  ;;  %v2667_v54 = vld [vmem:[#allocation6 + $0x184] ss:$16 sps:$4 sm:$0xff]   ;;  %v52_v56 = vld [vmem:[#allocation3 + $0x8] sm:$0xff]  ;;  %v67_v59 = vunpack.c.l.bf16 %v51_v53  ;;  %v68_v60 = vunpack.c.h.bf16 %v51_v53  ;;  %v3106_v61 = vsub.s32 %v231_v47, %v3103_v48  ;;  %v2671_v14 = vld [vmem:[#allocation6 + $0x180] ss:$16 sps:$4 sm:$0xff]   ;;  %vm304_vm2 = vcmask 1045509  }
  0x3a   :  { %1946 = vmatprep.subr.bf16.mxu0 %v2625_v20  ;;  %2110 = vmatprep.subr.bf16.mxu1 %v2627_v21  ;;  %v55_v57 = vld [vmem:[#allocation3 + $0x20] sm:$0xff]  ;;  %v56_v58 = vld [vmem:[#allocation3 + $0x28] sm:$0xff]  ;;  %v69_v1 = vunpack.c.l.bf16 %v52_v56  ;;  %v70_v2 = vunpack.c.h.bf16 %v52_v56  ;;  %vm306_vm3 = vcmask 1047559  }
  0x3b   :  { %v59_v62 = vld [vmem:[#allocation3 + $0x40] sm:$0xff]  ;;  %v60_v63 = vld [vmem:[#allocation3 + $0x48] sm:$0xff]  ;;  %v75_v3 = vunpack.c.l.bf16 %v55_v57  ;;  %v76_v4 = vunpack.c.h.bf16 %v55_v57  ;;  %v77_v6 = vunpack.c.l.bf16 %v56_v58  ;;  %v78_v7 = vunpack.c.h.bf16 %v56_v58 }
  0x3c   :  { %v63_v0 = vld [vmem:[#allocation3 + $0x60] sm:$0xff]  ;;  %v64_v5 = vld [vmem:[#allocation3 + $0x68] sm:$0xff]  ;;  %v83_v8 = vunpack.c.l.bf16 %v59_v62  ;;  %v84_v9 = vunpack.c.h.bf16 %v59_v62  ;;  %v85_v10 = vunpack.c.l.bf16 %v60_v63  ;;  %v86_v11 = vunpack.c.h.bf16 %v60_v63 }
  0x3d   :  { %1947 = vmatpush1.bf16.msra.mxu0 %v2629_v22  ;;  %2111 = vmatpush1.bf16.msra.mxu1 %v2630_v23  ;;  %v91_v12 = vunpack.c.l.bf16 %v63_v0  ;;  %v92_v13 = vunpack.c.h.bf16 %v63_v0  ;;  %v93_v16 = vunpack.c.l.bf16 %v64_v5  ;;  %v94_v17 = vunpack.c.h.bf16 %v64_v5  ;;  %v2673_v20 = vld [vmem:[#allocation6 + $0x1a4] ss:$16 sps:$4 sm:$0xff]  }
  0x3e   :  { %1948 = vmatprep.subr.bf16.mxu0 %v2631_v24  ;;  %2112 = vmatprep.subr.bf16.mxu1 %v2633_v25  ;;  %v99_v18 = vadd.f32 %v75_v3, %v67_v59  ;;  %v106_v19 = vadd.f32 %v76_v4, %v68_v60  ;;  %v113_v21 = vadd.f32 %v77_v6, %v69_v1  ;;  %v2675_v24 = vld [vmem:[#allocation6 + $0x1ac] ss:$16 sps:$4 sm:$0xff]   ;;  %v2684_v59 = vld [vmem:[#allocation6 + $0x1c8] ss:$16 sps:$4 sm:$0xff]   ;;  %v2685_v60 = vld [vmem:[#allocation6 + $0x1e4] ss:$16 sps:$4 sm:$0xff]  }
  0x3f   :  { %v120_v22 = vadd.f32 %v78_v7, %v70_v2  ;;  %v155_v23 = vadd.f32 %v91_v12, %v83_v8  ;;  %v2687_v2 = vld [vmem:[#allocation6 + $0x1ec] ss:$16 sps:$4 sm:$0xff]  }
  0x40   :  { %v100_v25 = vrot.slane %v99_v18, 4 }
  0x41   :  { %1949 = vmatpush1.bf16.msra.mxu0 %v2635_v26  ;;  %2113 = vmatpush1.bf16.msra.mxu1 %v2636_v27  ;;  %v107_v26 = vrot.slane %v106_v19, 4  ;;  %v162_v27 = vadd.f32 %v92_v13, %v84_v9 }
  0x42   :  { %1950 = vmatprep.subr.bf16.mxu0 %v2637_v28  ;;  %2114 = vmatprep.subr.bf16.mxu1 %v2639_v29  ;;  %v169_v28 = vadd.f32 %v93_v16, %v85_v10  ;;  %v114_v29 = vrot.slane %v113_v21, 4  ;;  %v2690_v16 = vld [vmem:[#allocation6 + $0x1e8] ss:$16 sps:$4 sm:$0xff]  }
  0x44   :  { %v115_v39 = vadd.f32 %v114_v29, %v113_v21  ;;  %v2693_v21 = vld [vmem:[#allocation6 + $0x204] ss:$16 sps:$4 sm:$0xff]  }
  0x45   :  { %1951 = vmatpush1.bf16.msra.mxu0 %v2641_v30  ;;  %2115 = vmatpush1.bf16.msra.mxu1 %v2642_v31  ;;  %v121_v30 = vrot.slane %v120_v22, 4  ;;  %v156_v31 = vrot.slane %v155_v23, 4 }
  0x46   :  { %1952 = vmatprep.subr.bf16.mxu0 %v2643_v32  ;;  %2116 = vmatprep.subr.bf16.mxu1 %v2645_v33  ;;  %v176_v32 = vadd.f32 %v94_v17, %v86_v11  ;;  %v101_v33 = vadd.f32 %v100_v25, %v99_v18  ;;  %v2689_v11 = vld [vmem:[#allocation6 + $0x1e0] ss:$16 sps:$4 sm:$0xff]   ;;  %v2696_v25 = vld [vmem:[#allocation6 + $0x20c] ss:$16 sps:$4 sm:$0xff]  }
  0x47   :  { %v122_v40 = vadd.f32 %v121_v30, %v120_v22  ;;  %v157_v41 = vadd.f32 %v156_v31, %v155_v23 }
  0x49   :  { %1953 = vmatpush1.bf16.msra.mxu0 %v2647_v34  ;;  %2117 = vmatpush1.bf16.msra.mxu1 %v2648_v35  ;;  %v108_v34 = vadd.f32 %v107_v26, %v106_v19  ;;  %v163_v35 = vrot.slane %v162_v27, 4 }
  0x4a   :  { %1954 = vmatprep.subr.bf16.mxu0 %v2649_v36  ;;  %2118 = vmatprep.subr.bf16.mxu1 %v2651_v37  ;;  %v170_v36 = vrot.slane %v169_v28, 4  ;;  %v2677_v37 = vld [vmem:[#allocation6 + $0x1a0] ss:$16 sps:$4 sm:$0xff]  }
  0x4b   :  { %v164_v47 = vadd.f32 %v163_v35, %v162_v27 }
  0x4d   :  { %1955 = vmatpush1.bf16.msra.mxu0 %v2653_v38  ;;  %2119 = vmatpush1.bf16.msra.mxu1 %v2654_v42  ;;  %v2678_v38 = vld [vmem:[#allocation6 + $0x1a8] ss:$16 sps:$4 sm:$0xff]   ;;  %v177_v42 = vrot.slane %v176_v32, 4  ;;  %v165_v57 = vrot.slane %v164_v47, 2 }
  0x4e   :  { %1956 = vmatprep.subr.bf16.mxu0 %v2655_v43  ;;  %2120 = vmatprep.subr.bf16.mxu1 %v2657_v44  ;;  %v2679_v43 = vld [vmem:[#allocation6 + $0x1c4] ss:$16 sps:$4 sm:$0xff]   ;;  %v2681_v44 = vld [vmem:[#allocation6 + $0x1cc] ss:$16 sps:$4 sm:$0xff]  }
  0x4f   :  { %v178_v53 = vadd.f32 %v177_v42, %v176_v32  ;;  %v166_v5 = vadd.f32 %v165_v57, %v164_v47  ;;  %v2708_v57 = vld [vmem:[#allocation6 + $0x24c] ss:$16 sps:$4 sm:$0xff]  }
  0x51   :  { %1957 = vmatpush1.bf16.msra.mxu0 %v2659_v45  ;;  %2121 = vmatpush1.bf16.msra.mxu1 %v2660_v46  ;;  %v102_v45 = vrot.slane %v101_v33, 2  ;;  %v109_v46 = vrot.slane %v108_v34, 2  ;;  %v179_v1 = vrot.slane %v178_v53, 2 }
  0x52   :  { %1958 = vmatprep.subr.bf16.mxu0 %v2661_v49  ;;  %2122 = vmatprep.subr.bf16.mxu1 %v2663_v50  ;;  %v171_v49 = vadd.f32 %v170_v36, %v169_v28  ;;  %v116_v50 = vrot.slane %v115_v39, 2 }
  0x53   :  { %v110_v56 = vadd.f32 %v109_v46, %v108_v34  ;;  %v180_v10 = vadd.f32 %v179_v1, %v178_v53  ;;  %v2694_v46 = vld [vmem:[#allocation6 + $0x208] ss:$16 sps:$4 sm:$0xff]   ;;  %v2717_v1 = vld [vmem:[#allocation6 + $0x284] ss:$16 sps:$4 sm:$0xff]  }
  0x54   :  { %v172_v58 = vrot.slane %v171_v49, 2  ;;  %v117_v62 = vadd.f32 %v116_v50, %v115_v39  ;;  %v2699_v50 = vld [vmem:[#allocation6 + $0x224] ss:$16 sps:$4 sm:$0xff]  }
  0x55   :  { %1959 = vmatpush1.bf16.msra.mxu0 %v2665_v51  ;;  %2123 = vmatpush1.bf16.msra.mxu1 %v2666_v52  ;;  %v123_v51 = vrot.slane %v122_v40, 2  ;;  %v158_v52 = vrot.slane %v157_v41, 2  ;;  %v111_v4 = vrot.slane %v110_v56, 1 }
  0x56   :  { %1960 = vmatprep.subr.bf16.mxu0 %v2667_v54  ;;  %2124 = vmatprep.subr.bf16.mxu1 %v2669_v55  ;;  %v2683_v54 = vld [vmem:[#allocation6 + $0x1c0] ss:$16 sps:$4 sm:$0xff]   ;;  %v103_v55 = vadd.f32 %v102_v45, %v101_v33  ;;  %v173_v6 = vadd.f32 %v172_v58, %v171_v49  ;;  %v118_v7 = vrot.slane %v117_v62, 1 }
  0x57   :  { %v124_v63 = vadd.f32 %v123_v51, %v122_v40  ;;  %v159_v0 = vadd.f32 %v158_v52, %v157_v41  ;;  %v112_v13 = vadd.f32 %v111_v4, %v110_v56  ;;  %v2691_v45 = vld [vmem:[#allocation6 + $0x200] ss:$16 sps:$4 sm:$0xff]   ;;  %v2702_v52 = vld [vmem:[#allocation6 + $0x22c] ss:$16 sps:$4 sm:$0xff]   ;;  %v2705_v56 = vld [vmem:[#allocation6 + $0x244] ss:$16 sps:$4 sm:$0xff]  }
  0x58   :  { %v104_v3 = vrot.slane %v103_v55, 1  ;;  %v119_v17 = vadd.f32 %v118_v7, %v117_v62  ;;  %v2703_v58 = vld [vmem:[#allocation6 + $0x240] ss:$16 sps:$4 sm:$0xff]   ;;  %v2714_v62 = vld [vmem:[#allocation6 + $0x26c] ss:$16 sps:$4 sm:$0xff]  }
  0x59   :  { %1961 = vmatpush1.bf16.msra.mxu0 %v2671_v14  ;;  %2125 = vmatpush1.bf16.msra.mxu1 %v2672_v15  ;;  %v125_v8 = vrot.slane %v124_v63, 1  ;;  %v160_v9 = vrot.slane %v159_v0, 1  ;;  %v167_v14 = vrot.slane %v166_v5, 1  ;;  %v174_v15 = vrot.slane %v173_v6, 1  ;;  %v2718_v4 = vld [vmem:[#allocation6 + $0x288] ss:$16 sps:$4 sm:$0xff]  }
  0x5a   :  { %1962 = vmatprep.subr.bf16.mxu0 %v2673_v20  ;;  %2126 = vmatprep.subr.bf16.mxu1 %v2675_v24  ;;  %v105_v12 = vadd.f32 %v104_v3, %v103_v55  ;;  %v181_v20 = vrot.slane %v180_v10, 1  ;;  %v2700_v55 = vld [vmem:[#allocation6 + $0x228] ss:$16 sps:$4 sm:$0xff]   ;;  %v2715_v3 = vld [vmem:[#allocation6 + $0x280] ss:$16 sps:$4 sm:$0xff]  }
  0x5b   :  { %v126_v18 = vadd.f32 %v125_v8, %v124_v63  ;;  %v161_v19 = vadd.f32 %v160_v9, %v159_v0  ;;  %v168_v22 = vadd.f32 %v167_v14, %v166_v5  ;;  %v175_v23 = vadd.f32 %v174_v15, %v173_v6  ;;  %v2709_v63 = vld [vmem:[#allocation6 + $0x260] ss:$16 sps:$4 sm:$0xff]   ;;  %v2712_v0 = vld [vmem:[#allocation6 + $0x268] ss:$16 sps:$4 sm:$0xff]   ;;  %v2723_v5 = vld [vmem:[#allocation6 + $0x2a4] ss:$16 sps:$4 sm:$0xff]  }
  0x5c   :  { %v227_v24 = vcombine.low %v105_v12, %v112_v13  ;;  %v182_v26 = vadd.f32 %v181_v20, %v180_v10  ;;  %v2726_v6 = vld [vmem:[#allocation6 + $0x2ac] ss:$16 sps:$4 sm:$0xff]   ;;  %v2721_v7 = vld [vmem:[#allocation6 + $0x2a0] ss:$16 sps:$4 sm:$0xff]   ;;  %v2724_v8 = vld [vmem:[#allocation6 + $0x2a8] ss:$16 sps:$4 sm:$0xff]  }
  0x5d   :  { %1963 = vmatpush1.bf16.msra.mxu0 %v2677_v37  ;;  %2127 = vmatpush1.bf16.msra.mxu1 %v2678_v38  ;;  %v228_v27 = vcombine.low %v119_v17, %v126_v18  ;;  %v261_v28 = vcombine.low %v161_v19, %v168_v22  ;;  %v2729_v9 = vld [vmem:[#allocation6 + $0x2c4] ss:$16 sps:$4 sm:$0xff]   ;;  %v2732_v10 = vld [vmem:[#allocation6 + $0x2cc] ss:$16 sps:$4 sm:$0xff]   ;;  %v2730_v12 = vld [vmem:[#allocation6 + $0x2c8] ss:$16 sps:$4 sm:$0xff]  }
  0x5e   :  { %1964 = vmatprep.subr.bf16.mxu0 %v2679_v43  ;;  %2128 = vmatprep.subr.bf16.mxu1 %v2681_v44  ;;  %v235_v29 = vrot.slane %v227_v24, %v3106_v61  ;;  %v262_v31 = vcombine.low %v175_v23, %v182_v26  ;;  %v2735_v13 = vld [vmem:[#allocation6 + $0x2e4] ss:$16 sps:$4 sm:$0xff]   ;;  %v2738_v14 = vld [vmem:[#allocation6 + $0x2ec] ss:$16 sps:$4 sm:$0xff]   ;;  %v2733_v15 = vld [vmem:[#allocation6 + $0x2e0] ss:$16 sps:$4 sm:$0xff]  }
  0x5f   :  { %v242_v30 = vrot.slane %v228_v27, %v3106_v61  ;;  %v269_v32 = vrot.slane %v261_v28, %v3106_v61  ;;  %v2741_v17 = vld [vmem:[#allocation6 + $0x304] ss:$16 sps:$4 sm:$0xff]   ;;  %v2744_v18 = vld [vmem:[#allocation6 + $0x30c] ss:$16 sps:$4 sm:$0xff]   ;;  %v2739_v19 = vld [vmem:[#allocation6 + $0x300] ss:$16 sps:$4 sm:$0xff]  }
  0x60   :  { %v276_v33 = vrot.slane %v262_v31, %v3106_v61  ;;  %v2742_v20 = vld [vmem:[#allocation6 + $0x308] ss:$16 sps:$4 sm:$0xff]   ;;  %v2750_v22 = vld [vmem:[#allocation6 + $0x32c] ss:$16 sps:$4 sm:$0xff]   ;;  %v2745_v23 = vld [vmem:[#allocation6 + $0x320] ss:$16 sps:$4 sm:$0xff]  }
  0x61   :  { %1965 = vmatpush1.bf16.msra.mxu0 %v2683_v54  ;;  %2129 = vmatpush1.bf16.msra.mxu1 %v2684_v59  ;;  %v243_v34 = vcombine.low %v235_v29, %v242_v30  ;;  %v2697_v54 = vld [vmem:[#allocation6 + $0x220] ss:$16 sps:$4 sm:$0xff]   ;;  %v2706_v59 = vld [vmem:[#allocation6 + $0x248] ss:$16 sps:$4 sm:$0xff]   ;;  %v2756_v26 = vld [vmem:[#allocation6 + $0x34c] ss:$16 sps:$4 sm:$0xff]  }
  0x62   :  { %1966 = vmatprep.subr.bf16.mxu0 %v2685_v60  ;;  %2130 = vmatprep.subr.bf16.mxu1 %v2687_v2  ;;  %v277_v35 = vcombine.low %v269_v32, %v276_v33  ;;  %v2711_v60 = vld [vmem:[#allocation6 + $0x264] ss:$16 sps:$4 sm:$0xff]   ;;  %v2720_v2 = vld [vmem:[#allocation6 + $0x28c] ss:$16 sps:$4 sm:$0xff]   ;;  %v2748_v24 = vld [vmem:[#allocation6 + $0x328] ss:$16 sps:$4 sm:$0xff]  }
  0x63   :  { %v2751_v27 = vld [vmem:[#allocation6 + $0x340] ss:$16 sps:$4 sm:$0xff]   ;;  %v2754_v28 = vld [vmem:[#allocation6 + $0x348] ss:$16 sps:$4 sm:$0xff]   ;;  %v2759_v29 = vld [vmem:[#allocation6 + $0x364] ss:$16 sps:$4 sm:$0xff]  }
  0x64   :  { %v299_v36 = vrot.slane %v277_v35, 7  ;;  %v2762_v30 = vld [vmem:[#allocation6 + $0x36c] ss:$16 sps:$4 sm:$0xff]   ;;  %v2757_v31 = vld [vmem:[#allocation6 + $0x360] ss:$16 sps:$4 sm:$0xff]  }
  0x65   :  { %1967 = vmatpush1.bf16.msra.mxu0 %v2689_v11  ;;  %2131 = vmatpush1.bf16.msra.mxu1 %v2690_v16  ;;  %v2727_v11 = vld [vmem:[#allocation6 + $0x2c0] ss:$16 sps:$4 sm:$0xff]   ;;  %v2736_v16 = vld [vmem:[#allocation6 + $0x2e8] ss:$16 sps:$4 sm:$0xff]   ;;  %v2765_v33 = vld [vmem:[#allocation6 + $0x384] ss:$16 sps:$4 sm:$0xff]  }
  0x66   :  { %1977 = vmatprep.subr.bf16.mxu0 %v2693_v21  ;;  %2141 = vmatprep.subr.bf16.mxu1 %v2696_v25  ;;  %v301_v37 = vsel %vm300_vm0, %v299_v36, %v243_v34  ;;  %v2747_v21 = vld [vmem:[#allocation6 + $0x324] ss:$16 sps:$4 sm:$0xff]   ;;  %v2760_v32 = vld [vmem:[#allocation6 + $0x368] ss:$16 sps:$4 sm:$0xff]   ;;  %v2768_v34 = vld [vmem:[#allocation6 + $0x38c] ss:$16 sps:$4 sm:$0xff]  }
  0x67   :  { %v303_v38 = vsel %vm302_vm1, %v299_v36, %v301_v37  ;;  %v2753_v25 = vld [vmem:[#allocation6 + $0x344] ss:$16 sps:$4 sm:$0xff]   ;;  %v2763_v35 = vld [vmem:[#allocation6 + $0x380] ss:$16 sps:$4 sm:$0xff]  }
  0x68   :  { %v305_v39 = vsel %vm304_vm2, %v299_v36, %v303_v38  ;;  %v2771_v37 = vld [vmem:[#allocation6 + $0x3a4] ss:$16 sps:$4 sm:$0xff]   ;;  %v2774_v38 = vld [vmem:[#allocation6 + $0x3ac] ss:$16 sps:$4 sm:$0xff]  }
  0x69   :  { %v307_v40 = vsel %vm306_vm3, %v299_v36, %v305_v39  ;;  %v2766_v36 = vld [vmem:[#allocation6 + $0x388] ss:$16 sps:$4 sm:$0xff]   ;;  %v2769_v39 = vld [vmem:[#allocation6 + $0x3a0] ss:$16 sps:$4 sm:$0xff]  }
  0x6a   :  { %v328_v41 = vcombine.high %v307_v40, %v307_v40  ;;  %v335_v42 = vrot.slane %v307_v40, %v3106_v61  ;;  %v2772_v40 = vld [vmem:[#allocation6 + $0x3a8] ss:$16 sps:$4 sm:$0xff]  }
  0x6c   :  { %v343_v43 = vcombine.high %v335_v42, %v335_v42  ;;  %v3118_v44 = vrot.slane %v328_v41, %v3106_v61  ;;  %v370_v47 = vpack.c.bf16 %v335_v42, %v335_v42  ;;  %v2777_v41 = vld [vmem:[#allocation6 + $0x3c4] ss:$16 sps:$4 sm:$0xff]   ;;  %v2780_v42 = vld [vmem:[#allocation6 + $0x3cc] ss:$16 sps:$4 sm:$0xff]  }
  0x6e   :  { %v371_v49 = vpack.c.bf16 %v343_v43, %v343_v43  ;;  %v344_v51 = vcombine.high %v3118_v44, %v3118_v44  ;;  %v3124_v43 = vpack.c.bf16 %v3118_v44, %v3118_v44  ;;  %v2775_v44 = vld [vmem:[#allocation6 + $0x3c0] ss:$16 sps:$4 sm:$0xff]  }
  0x70   :  { %1968 = vmatprep.mubr.bf16.mxu0 %v371_v49  ;;  %2132 = vmatprep.mubr.bf16.mxu1 %v371_v49  ;;  %v373_v53 = vpack.c.bf16 %v344_v51, %v344_v51  ;;  %v58_v49 = vld [vmem:[#allocation3 + $0x38] sm:$0xff] }
  0x71   :  { %1969 = vmatmul.mubr.bf16.vlgmr.msra.gmra.mrb[0].mxu0 %v370_v47  ;;  %2133 = vmatmul.mubr.bf16.vlgmr.msra.gmra.mrb[0].mxu1 %v370_v47  ;;  %v57_v47 = vld [vmem:[#allocation3 + $0x30] sm:$0xff]  ;;  %v62_v51 = vld [vmem:[#allocation3 + $0x58] sm:$0xff] }
  0x72   :  { %1978 = vmatpush1.bf16.msra.mxu0 %v2691_v45  ;;  %2142 = vmatpush1.bf16.msra.mxu1 %v2694_v46  ;;  %v53_v45 = vld [vmem:[#allocation3 + $0x10] sm:$0xff]  ;;  %v54_v46 = vld [vmem:[#allocation3 + $0x18] sm:$0xff] }
  0x73   :  { %1979 = vmatprep.subr.bf16.mxu0 %v2699_v50  ;;  %2143 = vmatprep.subr.bf16.mxu1 %v2702_v52  ;;  %v61_v50 = vld [vmem:[#allocation3 + $0x50] sm:$0xff]  ;;  %v71_v52 = vunpack.c.l.bf16 %v53_v45 }
  0x74   :  { %2009 = vmatprep.mubr.bf16.mxu0 %v373_v53  ;;  %2173 = vmatprep.mubr.bf16.mxu1 %v373_v53  ;;  %v72_v53 = vunpack.c.h.bf16 %v53_v45 }
  0x76   :  { %1980 = vmatpush1.bf16.msra.mxu0 %v2697_v54  ;;  %2144 = vmatpush1.bf16.msra.mxu1 %v2700_v55  ;;  %v73_v54 = vunpack.c.l.bf16 %v54_v46  ;;  %v74_v55 = vunpack.c.h.bf16 %v54_v46 }
  0x77   :  { %1981 = vmatprep.subr.bf16.mxu0 %v2705_v56  ;;  %2145 = vmatprep.subr.bf16.mxu1 %v2708_v57  ;;  %v65_v56 = vld [vmem:[#allocation3 + $0x70] sm:$0xff]  ;;  %v66_v57 = vld [vmem:[#allocation3 + $0x78] sm:$0xff] }
  0x7a   :  { %1982 = vmatpush1.bf16.msra.mxu0 %v2703_v58  ;;  %2146 = vmatpush1.bf16.msra.mxu1 %v2706_v59  ;;  %v79_v58 = vunpack.c.l.bf16 %v57_v47  ;;  %v80_v59 = vunpack.c.h.bf16 %v57_v47 }
  0x7b   :  { %1983 = vmatprep.subr.bf16.mxu0 %v2711_v60  ;;  %2147 = vmatprep.subr.bf16.mxu1 %v2714_v62  ;;  %v81_v60 = vunpack.c.l.bf16 %v58_v49  ;;  %v82_v62 = vunpack.c.h.bf16 %v58_v49 }
  0x7e   :  { %1984 = vmatpush1.bf16.msra.mxu0 %v2709_v63  ;;  %2148 = vmatpush1.bf16.msra.mxu1 %v2712_v0  ;;  %v2778_v63 = vld [vmem:[#allocation6 + $0x3c8] ss:$16 sps:$4 sm:$0xff]   ;;  %v87_v0 = vunpack.c.l.bf16 %v61_v50 }
  0x7f   :  { %1985 = vmatprep.subr.bf16.mxu0 %v2717_v1  ;;  %2149 = vmatprep.subr.bf16.mxu1 %v2720_v2  ;;  %v88_v1 = vunpack.c.h.bf16 %v61_v50  ;;  %v89_v2 = vunpack.c.l.bf16 %v62_v51  ;;  %v2795_v50 = vld [vmem:[#allocation6 + $0x424] ss:$16 sps:$4 sm:$0xff]  }
  0x82   :  { %1986 = vmatpush1.bf16.msra.mxu0 %v2715_v3  ;;  %2150 = vmatpush1.bf16.msra.mxu1 %v2718_v4  ;;  %v90_v3 = vunpack.c.h.bf16 %v62_v51  ;;  %v2783_v4 = vld [vmem:[#allocation6 + $0x3e4] ss:$16 sps:$4 sm:$0xff]   ;;  %v2798_v51 = vld [vmem:[#allocation6 + $0x42c] ss:$16 sps:$4 sm:$0xff]  }
  0x83   :  { %1987 = vmatprep.subr.bf16.mxu0 %v2723_v5  ;;  %2151 = vmatprep.subr.bf16.mxu1 %v2726_v6  ;;  %v95_v5 = vunpack.c.l.bf16 %v65_v56  ;;  %v96_v6 = vunpack.c.h.bf16 %v65_v56  ;;  %v2793_v56 = vld [vmem:[#allocation6 + $0x420] ss:$16 sps:$4 sm:$0xff]  }
  0x86   :  { %1988 = vmatpush1.bf16.msra.mxu0 %v2721_v7  ;;  %2152 = vmatpush1.bf16.msra.mxu1 %v2724_v8  ;;  %v97_v7 = vunpack.c.l.bf16 %v66_v57  ;;  %v98_v8 = vunpack.c.h.bf16 %v66_v57 }
  0x87   :  { %1989 = vmatprep.subr.bf16.mxu0 %v2729_v9  ;;  %2153 = vmatprep.subr.bf16.mxu1 %v2732_v10  ;;  %v2786_v9 = vld [vmem:[#allocation6 + $0x3ec] ss:$16 sps:$4 sm:$0xff]   ;;  %v127_v10 = vadd.f32 %v79_v58, %v71_v52 }
  0x8a   :  { %1990 = vmatpush1.bf16.msra.mxu0 %v2727_v11  ;;  %2154 = vmatpush1.bf16.msra.mxu1 %v2730_v12  ;;  %v134_v11 = vadd.f32 %v80_v59, %v72_v53  ;;  %v141_v12 = vadd.f32 %v81_v60, %v73_v54 }
  0x8b   :  { %1991 = vmatprep.subr.bf16.mxu0 %v2735_v13  ;;  %2155 = vmatprep.subr.bf16.mxu1 %v2738_v14  ;;  %v2781_v13 = vld [vmem:[#allocation6 + $0x3e0] ss:$16 sps:$4 sm:$0xff]   ;;  %v148_v14 = vadd.f32 %v82_v62, %v74_v55  ;;  %v2796_v62 = vld [vmem:[#allocation6 + $0x428] ss:$16 sps:$4 sm:$0xff]  }
  0x8e   :  { %1992 = vmatpush1.bf16.msra.mxu0 %v2733_v15  ;;  %2156 = vmatpush1.bf16.msra.mxu1 %v2736_v16  ;;  %v183_v15 = vadd.f32 %v95_v5, %v87_v0  ;;  %v190_v16 = vadd.f32 %v96_v6, %v88_v1  ;;  %v2801_v6 = vld [vmem:[#allocation6 + $0x444] ss:$16 sps:$4 sm:$0xff]  }
  0x8f   :  { %1993 = vmatprep.subr.bf16.mxu0 %v2741_v17  ;;  %2157 = vmatprep.subr.bf16.mxu1 %v2744_v18  ;;  %v197_v17 = vadd.f32 %v97_v7, %v89_v2  ;;  %v2784_v18 = vld [vmem:[#allocation6 + $0x3e8] ss:$16 sps:$4 sm:$0xff]   ;;  %v2804_v7 = vld [vmem:[#allocation6 + $0x44c] ss:$16 sps:$4 sm:$0xff]  }
  0x92   :  { %1994 = vmatpush1.bf16.msra.mxu0 %v2739_v19  ;;  %2158 = vmatpush1.bf16.msra.mxu1 %v2742_v20  ;;  %v128_v19 = vrot.slane %v127_v10, 4  ;;  %v135_v20 = vrot.slane %v134_v11, 4 }
  0x93   :  { %1995 = vmatprep.subr.bf16.mxu0 %v2747_v21  ;;  %2159 = vmatprep.subr.bf16.mxu1 %v2750_v22  ;;  %v142_v21 = vrot.slane %v141_v12, 4  ;;  %v204_v22 = vadd.f32 %v98_v8, %v90_v3 }
  0x96   :  { %1996 = vmatpush1.bf16.msra.mxu0 %v2745_v23  ;;  %2160 = vmatpush1.bf16.msra.mxu1 %v2748_v24  ;;  %v2789_v23 = vld [vmem:[#allocation6 + $0x404] ss:$16 sps:$4 sm:$0xff]   ;;  %v149_v24 = vrot.slane %v148_v14, 4 }
  0x97   :  { %1997 = vmatprep.subr.bf16.mxu0 %v2753_v25  ;;  %2161 = vmatprep.subr.bf16.mxu1 %v2756_v26  ;;  %v184_v25 = vrot.slane %v183_v15, 4  ;;  %v191_v26 = vrot.slane %v190_v16, 4 }
  0x9a   :  { %1998 = vmatpush1.bf16.msra.mxu0 %v2751_v27  ;;  %2162 = vmatpush1.bf16.msra.mxu1 %v2754_v28  ;;  %v198_v27 = vrot.slane %v197_v17, 4  ;;  %v2792_v28 = vld [vmem:[#allocation6 + $0x40c] ss:$16 sps:$4 sm:$0xff]  }
  0x9b   :  { %1999 = vmatprep.subr.bf16.mxu0 %v2759_v29  ;;  %2163 = vmatprep.subr.bf16.mxu1 %v2762_v30  ;;  %v129_v29 = vadd.f32 %v128_v19, %v127_v10  ;;  %v136_v30 = vadd.f32 %v135_v20, %v134_v11  ;;  %v2807_v19 = vld [vmem:[#allocation6 + $0x464] ss:$16 sps:$4 sm:$0xff]  }
  0x9e   :  { %2000 = vmatpush1.bf16.msra.mxu0 %v2757_v31  ;;  %2164 = vmatpush1.bf16.msra.mxu1 %v2760_v32  ;;  %v143_v31 = vadd.f32 %v142_v21, %v141_v12  ;;  %v205_v32 = vrot.slane %v204_v22, 4 }
  0x9f   :  { %2001 = vmatprep.subr.bf16.mxu0 %v2765_v33  ;;  %2165 = vmatprep.subr.bf16.mxu1 %v2768_v34  ;;  %v150_v33 = vadd.f32 %v149_v24, %v148_v14  ;;  %v185_v34 = vadd.f32 %v184_v25, %v183_v15  ;;  %v2799_v15 = vld [vmem:[#allocation6 + $0x440] ss:$16 sps:$4 sm:$0xff]  }
  0xa1   :  { %v151_v45 = vrot.slane %v150_v33, 2  ;;  %v186_v46 = vrot.slane %v185_v34, 2 }
  0xa2   :  { %2002 = vmatpush1.bf16.msra.mxu0 %v2763_v35  ;;  %2166 = vmatpush1.bf16.msra.mxu1 %v2766_v36  ;;  %v192_v35 = vadd.f32 %v191_v26, %v190_v16  ;;  %v199_v36 = vadd.f32 %v198_v27, %v197_v17  ;;  %v2802_v16 = vld [vmem:[#allocation6 + $0x448] ss:$16 sps:$4 sm:$0xff]   ;;  %v2805_v27 = vld [vmem:[#allocation6 + $0x460] ss:$16 sps:$4 sm:$0xff]  }
  0xa3   :  { %2003 = vmatprep.subr.bf16.mxu0 %v2771_v37  ;;  %2167 = vmatprep.subr.bf16.mxu1 %v2774_v38  ;;  %v2787_v37 = vld [vmem:[#allocation6 + $0x400] ss:$16 sps:$4 sm:$0xff]   ;;  %v130_v38 = vrot.slane %v129_v29, 2  ;;  %v152_v57 = vadd.f32 %v151_v45, %v150_v33  ;;  %v187_v58 = vadd.f32 %v186_v46, %v185_v34  ;;  %v2825_v46 = vld [vmem:[#allocation6 + $0x4c4] ss:$16 sps:$4 sm:$0xff]  }
  0xa4   :  { %v193_v47 = vrot.slane %v192_v35, 2  ;;  %v200_v49 = vrot.slane %v199_v36, 2  ;;  %v2811_v34 = vld [vmem:[#allocation6 + $0x480] ss:$16 sps:$4 sm:$0xff]  }
  0xa5   :  { %v131_v52 = vadd.f32 %v130_v38, %v129_v29  ;;  %v153_v2 = vrot.slane %v152_v57, 1  ;;  %v188_v3 = vrot.slane %v187_v58, 1  ;;  %v2822_v38 = vld [vmem:[#allocation6 + $0x4ac] ss:$16 sps:$4 sm:$0xff]  }
  0xa6   :  { %2004 = vmatpush1.bf16.msra.mxu0 %v2769_v39  ;;  %2168 = vmatpush1.bf16.msra.mxu1 %v2772_v40  ;;  %v137_v39 = vrot.slane %v136_v30, 2  ;;  %v144_v40 = vrot.slane %v143_v31, 2  ;;  %v194_v59 = vadd.f32 %v193_v47, %v192_v35  ;;  %v201_v60 = vadd.f32 %v200_v49, %v199_v36  ;;  %v2814_v35 = vld [vmem:[#allocation6 + $0x488] ss:$16 sps:$4 sm:$0xff]   ;;  %v2828_v49 = vld [vmem:[#allocation6 + $0x4cc] ss:$16 sps:$4 sm:$0xff]  }
  0xa7   :  { %2005 = vmatprep.subr.bf16.mxu0 %v2777_v41  ;;  %2169 = vmatprep.subr.bf16.mxu1 %v2780_v42  ;;  %v206_v41 = vadd.f32 %v205_v32, %v204_v22  ;;  %v2790_v42 = vld [vmem:[#allocation6 + $0x408] ss:$16 sps:$4 sm:$0xff]   ;;  %v189_v12 = vadd.f32 %v188_v3, %v187_v58  ;;  %v2810_v22 = vld [vmem:[#allocation6 + $0x46c] ss:$16 sps:$4 sm:$0xff]   ;;  %v2849_v3 = vld [vmem:[#allocation6 + $0x544] ss:$16 sps:$4 sm:$0xff]  }
  0xa8   :  { %v138_v53 = vadd.f32 %v137_v39, %v136_v30  ;;  %v145_v54 = vadd.f32 %v144_v40, %v143_v31  ;;  %v202_v5 = vrot.slane %v201_v60, 1  ;;  %v2813_v30 = vld [vmem:[#allocation6 + $0x484] ss:$16 sps:$4 sm:$0xff]   ;;  %v2816_v31 = vld [vmem:[#allocation6 + $0x48c] ss:$16 sps:$4 sm:$0xff]  }
  0xa9   :  { %v207_v55 = vrot.slane %v206_v41, 2  ;;  %v2832_v58 = vld [vmem:[#allocation6 + $0x4e8] ss:$16 sps:$4 sm:$0xff]  }
  0xaa   :  { %2006 = vmatpush1.bf16.msra.mxu0 %v2775_v44  ;;  %2170 = vmatpush1.bf16.msra.mxu1 %v2778_v63  ;;  %v132_v44 = vrot.slane %v131_v52, 1  ;;  %v139_v63 = vrot.slane %v138_v53, 1  ;;  %v146_v0 = vrot.slane %v145_v54, 1  ;;  %v203_v14 = vadd.f32 %v202_v5, %v201_v60  ;;  %v2840_v60 = vld [vmem:[#allocation6 + $0x50c] ss:$16 sps:$4 sm:$0xff]  }
  0xab   :  { %2007 = vmatprep.subr.bf16.mxu0 %v2783_v4  ;;  %2171 = vmatprep.subr.bf16.mxu1 %v2786_v9  ;;  %v208_v1 = vadd.f32 %v207_v55, %v206_v41  ;;  %v195_v4 = vrot.slane %v194_v59, 1  ;;  %v2817_v41 = vld [vmem:[#allocation6 + $0x4a0] ss:$16 sps:$4 sm:$0xff]   ;;  %v2834_v55 = vld [vmem:[#allocation6 + $0x4ec] ss:$16 sps:$4 sm:$0xff]  }
  0xac   :  { %v133_v8 = vadd.f32 %v132_v44, %v131_v52  ;;  %v140_v9 = vadd.f32 %v139_v63, %v138_v53  ;;  %v147_v10 = vadd.f32 %v146_v0, %v145_v54  ;;  %v2826_v52 = vld [vmem:[#allocation6 + $0x4c8] ss:$16 sps:$4 sm:$0xff]   ;;  %v2831_v54 = vld [vmem:[#allocation6 + $0x4e4] ss:$16 sps:$4 sm:$0xff]   ;;  %v2846_v0 = vld [vmem:[#allocation6 + $0x52c] ss:$16 sps:$4 sm:$0xff]  }
  0xad   :  { %v209_v11 = vrot.slane %v208_v1, 1  ;;  %v2838_v44 = vld [vmem:[#allocation6 + $0x508] ss:$16 sps:$4 sm:$0xff]   ;;  %v2843_v63 = vld [vmem:[#allocation6 + $0x524] ss:$16 sps:$4 sm:$0xff]  }
  0xae   :  { %2008 = vmatpush1.bf16.msra.mxu0 %v2781_v13  ;;  %2172 = vmatpush1.bf16.msra.mxu1 %v2784_v18  ;;  %v196_v13 = vadd.f32 %v195_v4, %v194_v59  ;;  %v244_v18 = vcombine.low %v133_v8, %v140_v9  ;;  %v2837_v59 = vld [vmem:[#allocation6 + $0x504] ss:$16 sps:$4 sm:$0xff]   ;;  %v2852_v4 = vld [vmem:[#allocation6 + $0x54c] ss:$16 sps:$4 sm:$0xff]   ;;  %v2847_v5 = vld [vmem:[#allocation6 + $0x540] ss:$16 sps:$4 sm:$0xff]  }
  0xaf   :  { %2018 = vmatprep.subr.bf16.mxu0 %v2789_v23  ;;  %2182 = vmatprep.subr.bf16.mxu1 %v2792_v28  ;;  %v210_v17 = vadd.f32 %v209_v11, %v208_v1  ;;  %v2808_v28 = vld [vmem:[#allocation6 + $0x468] ss:$16 sps:$4 sm:$0xff]   ;;  %v2841_v1 = vld [vmem:[#allocation6 + $0x520] ss:$16 sps:$4 sm:$0xff]   ;;  %v2858_v8 = vld [vmem:[#allocation6 + $0x56c] ss:$16 sps:$4 sm:$0xff]  }
  0xb0   :  { %v278_v21 = vcombine.low %v189_v12, %v196_v13  ;;  %v252_v23 = vrot.slane %v244_v18, %v3106_v61  ;;  %v2853_v9 = vld [vmem:[#allocation6 + $0x560] ss:$16 sps:$4 sm:$0xff]   ;;  %v2861_v11 = vld [vmem:[#allocation6 + $0x584] ss:$16 sps:$4 sm:$0xff]   ;;  %v2862_v13 = vld [vmem:[#allocation6 + $0x588] ss:$16 sps:$4 sm:$0xff]  }
  0xb1   :  { %2010 = vmatmul.mubr.bf16.vlgmr.msra.gmra.mrb[0].mxu0 %v3124_v43  ;;  %2174 = vmatmul.mubr.bf16.vlgmr.msra.gmra.mrb[0].mxu1 %v3124_v43  ;;  %v154_v43 = vadd.f32 %v153_v2, %v152_v57  ;;  %v279_v24 = vcombine.low %v203_v14, %v210_v17  ;;  %v2829_v57 = vld [vmem:[#allocation6 + $0x4e0] ss:$16 sps:$4 sm:$0xff]   ;;  %v2844_v2 = vld [vmem:[#allocation6 + $0x528] ss:$16 sps:$4 sm:$0xff]   ;;  %v2867_v14 = vld [vmem:[#allocation6 + $0x5a4] ss:$16 sps:$4 sm:$0xff]  }
  0xb2   :  { %2019 = vmatpush1.bf16.msra.mxu0 %v2787_v37  ;;  %2183 = vmatpush1.bf16.msra.mxu1 %v2790_v42  ;;  %v286_v26 = vrot.slane %v278_v21, %v3106_v61  ;;  %v2819_v37 = vld [vmem:[#allocation6 + $0x4a4] ss:$16 sps:$4 sm:$0xff]   ;;  %v2820_v42 = vld [vmem:[#allocation6 + $0x4a8] ss:$16 sps:$4 sm:$0xff]   ;;  %v2859_v12 = vld [vmem:[#allocation6 + $0x580] ss:$16 sps:$4 sm:$0xff]  }
  0xb3   :  { %2020 = vmatprep.subr.bf16.mxu0 %v2795_v50  ;;  %2184 = vmatprep.subr.bf16.mxu1 %v2798_v51  ;;  %v245_v20 = vcombine.low %v147_v10, %v154_v43  ;;  %v293_v29 = vrot.slane %v279_v24, %v3106_v61  ;;  %v2823_v51 = vld [vmem:[#allocation6 + $0x4c0] ss:$16 sps:$4 sm:$0xff]   ;;  %v2856_v10 = vld [vmem:[#allocation6 + $0x568] ss:$16 sps:$4 sm:$0xff]   ;;  %v2864_v43 = vld [vmem:[#allocation6 + $0x58c] ss:$16 sps:$4 sm:$0xff]  }
  0xb4   :  { %v2868_v17 = vld [vmem:[#allocation6 + $0x5a8] ss:$16 sps:$4 sm:$0xff]   ;;  %v2873_v18 = vld [vmem:[#allocation6 + $0x5c4] ss:$16 sps:$4 sm:$0xff]   ;;  %v2871_v21 = vld [vmem:[#allocation6 + $0x5c0] ss:$16 sps:$4 sm:$0xff]  }
  0xb5   :  { %v259_v25 = vrot.slane %v245_v20, %v3106_v61  ;;  %v294_v33 = vcombine.low %v286_v26, %v293_v29  ;;  %v2882_v24 = vld [vmem:[#allocation6 + $0x5ec] ss:$16 sps:$4 sm:$0xff]   ;;  %v2877_v26 = vld [vmem:[#allocation6 + $0x5e0] ss:$16 sps:$4 sm:$0xff]  }
  0xb6   :  { %2021 = vmatpush1.bf16.msra.mxu0 %v2793_v56  ;;  %2185 = vmatpush1.bf16.msra.mxu1 %v2796_v62  ;;  %v2835_v62 = vld [vmem:[#allocation6 + $0x500] ss:$16 sps:$4 sm:$0xff]   ;;  %v2888_v29 = vld [vmem:[#allocation6 + $0x60c] ss:$16 sps:$4 sm:$0xff]  }
  0xb7   :  { %2022 = vmatprep.subr.bf16.mxu0 %v2801_v6  ;;  %2186 = vmatprep.subr.bf16.mxu1 %v2804_v7  ;;  %v260_v32 = vcombine.low %v252_v23, %v259_v25  ;;  %v310_v36 = vrot.slane %v294_v33, 7  ;;  %v2850_v6 = vld [vmem:[#allocation6 + $0x548] ss:$16 sps:$4 sm:$0xff]   ;;  %v2855_v7 = vld [vmem:[#allocation6 + $0x564] ss:$16 sps:$4 sm:$0xff]  }
  0xb8   :  { %v2879_v23 = vld [vmem:[#allocation6 + $0x5e4] ss:$16 sps:$4 sm:$0xff]   ;;  %v2886_v33 = vld [vmem:[#allocation6 + $0x608] ss:$16 sps:$4 sm:$0xff]  }
  0xb9   :  { %v311_v39 = vsel %vm300_vm0, %v310_v36, %v260_v32  ;;  %v2883_v32 = vld [vmem:[#allocation6 + $0x600] ss:$16 sps:$4 sm:$0xff]  }
  0xba   :  { %2023 = vmatpush1.bf16.msra.mxu0 %v2799_v15  ;;  %2187 = vmatpush1.bf16.msra.mxu1 %v2802_v16  ;;  %v312_v40 = vsel %vm302_vm1, %v310_v36, %v311_v39  ;;  %v2870_v15 = vld [vmem:[#allocation6 + $0x5ac] ss:$16 sps:$4 sm:$0xff]   ;;  %v2865_v16 = vld [vmem:[#allocation6 + $0x5a0] ss:$16 sps:$4 sm:$0xff]   ;;  %v2897_v39 = vld [vmem:[#allocation6 + $0x644] ss:$16 sps:$4 sm:$0xff]  }
  0xbb   :  { %2024 = vmatprep.subr.bf16.mxu0 %v2807_v19  ;;  %2188 = vmatprep.subr.bf16.mxu1 %v2810_v22  ;;  %v313_v45 = vsel %vm304_vm2, %v310_v36, %v312_v40  ;;  %v2876_v19 = vld [vmem:[#allocation6 + $0x5cc] ss:$16 sps:$4 sm:$0xff]   ;;  %v2874_v22 = vld [vmem:[#allocation6 + $0x5c8] ss:$16 sps:$4 sm:$0xff]  }
  0xbc   :  { %v3136_v47 = vsel %vm306_vm3, %v310_v36, %v313_v45  ;;  %v2900_v40 = vld [vmem:[#allocation6 + $0x64c] ss:$16 sps:$4 sm:$0xff]   ;;  %v2903_v45 = vld [vmem:[#allocation6 + $0x664] ss:$16 sps:$4 sm:$0xff]  }
  0xbd   :  { %v3140_v50 = vrot.slane %v3136_v47, %v3106_v61  ;;  %v345_v20 = vcombine.high %v3136_v47, %v3136_v47  ;;  %v2901_v47 = vld [vmem:[#allocation6 + $0x660] ss:$16 sps:$4 sm:$0xff]  }
  0xbe   :  { %2025 = vmatpush1.bf16.msra.mxu0 %v2805_v27  ;;  %2189 = vmatpush1.bf16.msra.mxu1 %v2808_v28  ;;  %v2880_v27 = vld [vmem:[#allocation6 + $0x5e8] ss:$16 sps:$4 sm:$0xff]   ;;  %v2885_v28 = vld [vmem:[#allocation6 + $0x604] ss:$16 sps:$4 sm:$0xff]  }
  0xbf   :  { %2026 = vmatprep.subr.bf16.mxu0 %v2813_v30  ;;  %2190 = vmatprep.subr.bf16.mxu1 %v2816_v31  ;;  %v360_v53 = vcombine.high %v3140_v50, %v3140_v50  ;;  %v3147_v25 = vrot.slane %v345_v20, %v3106_v61  ;;  %v374_v31 = vpack.c.bf16 %v3140_v50, %v3140_v50  ;;  %v2909_v50 = vld [vmem:[#allocation6 + $0x684] ss:$16 sps:$4 sm:$0xff]   ;;  %v2958_v20 = vld [vmem:[#allocation6 + $0x788] ss:$16 sps:$4 sm:$0xff]  }
  0xc1   :  { %v375_v56 = vpack.c.bf16 %v360_v53, %v360_v53  ;;  %v361_v30 = vcombine.high %v3147_v25, %v3147_v25  ;;  %v2910_v53 = vld [vmem:[#allocation6 + $0x688] ss:$16 sps:$4 sm:$0xff]  }
  0xc2   :  { %2027 = vmatpush1.bf16.msra.mxu0 %v2811_v34  ;;  %2191 = vmatpush1.bf16.msra.mxu1 %v2814_v35  ;;  %v2891_v34 = vld [vmem:[#allocation6 + $0x624] ss:$16 sps:$4 sm:$0xff]   ;;  %v2894_v35 = vld [vmem:[#allocation6 + $0x62c] ss:$16 sps:$4 sm:$0xff]  }
  0xc3   :  { %2028 = vmatprep.subr.bf16.mxu0 %v2819_v37  ;;  %2192 = vmatprep.subr.bf16.mxu1 %v2822_v38  ;;  %v377_v36 = vpack.c.bf16 %v361_v30, %v361_v30  ;;  %v2889_v37 = vld [vmem:[#allocation6 + $0x620] ss:$16 sps:$4 sm:$0xff]   ;;  %v2892_v38 = vld [vmem:[#allocation6 + $0x628] ss:$16 sps:$4 sm:$0xff]   ;;  %v2975_v30 = vld [vmem:[#allocation6 + $0x7e4] ss:$16 sps:$4 sm:$0xff]  }
  0xc4   :  { %2050 = vmatprep.mubr.bf16.mxu0 %v375_v56  ;;  %2214 = vmatprep.mubr.bf16.mxu1 %v375_v56  ;;  %v2913_v56 = vld [vmem:[#allocation6 + $0x6a0] ss:$16 sps:$4 sm:$0xff]  }
  0xc6   :  { %2029 = vmatpush1.bf16.msra.mxu0 %v2817_v41  ;;  %2193 = vmatpush1.bf16.msra.mxu1 %v2820_v42  ;;  %v2895_v41 = vld [vmem:[#allocation6 + $0x640] ss:$16 sps:$4 sm:$0xff]   ;;  %v2898_v42 = vld [vmem:[#allocation6 + $0x648] ss:$16 sps:$4 sm:$0xff]  }
  0xc7   :  { %2030 = vmatprep.subr.bf16.mxu0 %v2825_v46  ;;  %2194 = vmatprep.subr.bf16.mxu1 %v2828_v49  ;;  %v2906_v46 = vld [vmem:[#allocation6 + $0x66c] ss:$16 sps:$4 sm:$0xff]   ;;  %v2904_v49 = vld [vmem:[#allocation6 + $0x668] ss:$16 sps:$4 sm:$0xff]  }
  0xca   :  { %2031 = vmatpush1.bf16.msra.mxu0 %v2823_v51  ;;  %2195 = vmatpush1.bf16.msra.mxu1 %v2826_v52  ;;  %v2912_v51 = vld [vmem:[#allocation6 + $0x68c] ss:$16 sps:$4 sm:$0xff]   ;;  %v2907_v52 = vld [vmem:[#allocation6 + $0x680] ss:$16 sps:$4 sm:$0xff]  }
  0xcb   :  { %2032 = vmatprep.subr.bf16.mxu0 %v2831_v54  ;;  %2196 = vmatprep.subr.bf16.mxu1 %v2834_v55  ;;  %v2915_v54 = vld [vmem:[#allocation6 + $0x6a4] ss:$16 sps:$4 sm:$0xff]   ;;  %v2918_v55 = vld [vmem:[#allocation6 + $0x6ac] ss:$16 sps:$4 sm:$0xff]  }
  0xce   :  { %2033 = vmatpush1.bf16.msra.mxu0 %v2829_v57  ;;  %2197 = vmatpush1.bf16.msra.mxu1 %v2832_v58  ;;  %v2916_v57 = vld [vmem:[#allocation6 + $0x6a8] ss:$16 sps:$4 sm:$0xff]   ;;  %v2921_v58 = vld [vmem:[#allocation6 + $0x6c4] ss:$16 sps:$4 sm:$0xff]  }
  0xcf   :  { %2034 = vmatprep.subr.bf16.mxu0 %v2837_v59  ;;  %2198 = vmatprep.subr.bf16.mxu1 %v2840_v60  ;;  %v2924_v59 = vld [vmem:[#allocation6 + $0x6cc] ss:$16 sps:$4 sm:$0xff]   ;;  %v2919_v60 = vld [vmem:[#allocation6 + $0x6c0] ss:$16 sps:$4 sm:$0xff]  }
  0xd2   :  { %2035 = vmatpush1.bf16.msra.mxu0 %v2835_v62  ;;  %2199 = vmatpush1.bf16.msra.mxu1 %v2838_v44  ;;  %v2922_v62 = vld [vmem:[#allocation6 + $0x6c8] ss:$16 sps:$4 sm:$0xff]   ;;  %v2927_v44 = vld [vmem:[#allocation6 + $0x6e4] ss:$16 sps:$4 sm:$0xff]  }
  0xd3   :  { %2036 = vmatprep.subr.bf16.mxu0 %v2843_v63  ;;  %2200 = vmatprep.subr.bf16.mxu1 %v2846_v0  ;;  %v2930_v63 = vld [vmem:[#allocation6 + $0x6ec] ss:$16 sps:$4 sm:$0xff]   ;;  %v2925_v0 = vld [vmem:[#allocation6 + $0x6e0] ss:$16 sps:$4 sm:$0xff]  }
  0xd6   :  { %2037 = vmatpush1.bf16.msra.mxu0 %v2841_v1  ;;  %2201 = vmatpush1.bf16.msra.mxu1 %v2844_v2  ;;  %v2928_v1 = vld [vmem:[#allocation6 + $0x6e8] ss:$16 sps:$4 sm:$0xff]   ;;  %v2933_v2 = vld [vmem:[#allocation6 + $0x704] ss:$16 sps:$4 sm:$0xff]  }
  0xd7   :  { %2038 = vmatprep.subr.bf16.mxu0 %v2849_v3  ;;  %2202 = vmatprep.subr.bf16.mxu1 %v2852_v4  ;;  %v2936_v3 = vld [vmem:[#allocation6 + $0x70c] ss:$16 sps:$4 sm:$0xff]   ;;  %v2931_v4 = vld [vmem:[#allocation6 + $0x700] ss:$16 sps:$4 sm:$0xff]  }
  0xda   :  { %2039 = vmatpush1.bf16.msra.mxu0 %v2847_v5  ;;  %2203 = vmatpush1.bf16.msra.mxu1 %v2850_v6  ;;  %v2934_v5 = vld [vmem:[#allocation6 + $0x708] ss:$16 sps:$4 sm:$0xff]   ;;  %v2939_v6 = vld [vmem:[#allocation6 + $0x724] ss:$16 sps:$4 sm:$0xff]  }
  0xdb   :  { %2040 = vmatprep.subr.bf16.mxu0 %v2855_v7  ;;  %2204 = vmatprep.subr.bf16.mxu1 %v2858_v8  ;;  %v2942_v7 = vld [vmem:[#allocation6 + $0x72c] ss:$16 sps:$4 sm:$0xff]   ;;  %v2937_v8 = vld [vmem:[#allocation6 + $0x720] ss:$16 sps:$4 sm:$0xff]  }
  0xde   :  { %2041 = vmatpush1.bf16.msra.mxu0 %v2853_v9  ;;  %2205 = vmatpush1.bf16.msra.mxu1 %v2856_v10  ;;  %v2940_v9 = vld [vmem:[#allocation6 + $0x728] ss:$16 sps:$4 sm:$0xff]   ;;  %v2945_v10 = vld [vmem:[#allocation6 + $0x744] ss:$16 sps:$4 sm:$0xff]  }
  0xdf   :  { %2042 = vmatprep.subr.bf16.mxu0 %v2861_v11  ;;  %2206 = vmatprep.subr.bf16.mxu1 %v2864_v43  ;;  %v2948_v11 = vld [vmem:[#allocation6 + $0x74c] ss:$16 sps:$4 sm:$0xff]   ;;  %v2943_v43 = vld [vmem:[#allocation6 + $0x740] ss:$16 sps:$4 sm:$0xff]  }
  0xe2   :  { %2043 = vmatpush1.bf16.msra.mxu0 %v2859_v12  ;;  %2207 = vmatpush1.bf16.msra.mxu1 %v2862_v13  ;;  %v2946_v12 = vld [vmem:[#allocation6 + $0x748] ss:$16 sps:$4 sm:$0xff]   ;;  %v2951_v13 = vld [vmem:[#allocation6 + $0x764] ss:$16 sps:$4 sm:$0xff]  }
  0xe3   :  { %2044 = vmatprep.subr.bf16.mxu0 %v2867_v14  ;;  %2208 = vmatprep.subr.bf16.mxu1 %v2870_v15  ;;  %v2954_v14 = vld [vmem:[#allocation6 + $0x76c] ss:$16 sps:$4 sm:$0xff]   ;;  %v2949_v15 = vld [vmem:[#allocation6 + $0x760] ss:$16 sps:$4 sm:$0xff]  }
  0xe6   :  { %2045 = vmatpush1.bf16.msra.mxu0 %v2865_v16  ;;  %2209 = vmatpush1.bf16.msra.mxu1 %v2868_v17  ;;  %v2952_v16 = vld [vmem:[#allocation6 + $0x768] ss:$16 sps:$4 sm:$0xff]   ;;  %v2957_v17 = vld [vmem:[#allocation6 + $0x784] ss:$16 sps:$4 sm:$0xff]  }
  0xe7   :  { %2046 = vmatprep.subr.bf16.mxu0 %v2873_v18  ;;  %2210 = vmatprep.subr.bf16.mxu1 %v2876_v19  ;;  %v2960_v18 = vld [vmem:[#allocation6 + $0x78c] ss:$16 sps:$4 sm:$0xff]   ;;  %v2955_v19 = vld [vmem:[#allocation6 + $0x780] ss:$16 sps:$4 sm:$0xff]  }
  0xea   :  { %2047 = vmatpush1.bf16.msra.mxu0 %v2871_v21  ;;  %2211 = vmatpush1.bf16.msra.mxu1 %v2874_v22  ;;  %v2963_v21 = vld [vmem:[#allocation6 + $0x7a4] ss:$16 sps:$4 sm:$0xff]   ;;  %v2966_v22 = vld [vmem:[#allocation6 + $0x7ac] ss:$16 sps:$4 sm:$0xff]  }
  0xeb   :  { %2048 = vmatprep.subr.bf16.mxu0 %v2879_v23  ;;  %2212 = vmatprep.subr.bf16.mxu1 %v2882_v24  ;;  %v2961_v23 = vld [vmem:[#allocation6 + $0x7a0] ss:$16 sps:$4 sm:$0xff]   ;;  %v2964_v24 = vld [vmem:[#allocation6 + $0x7a8] ss:$16 sps:$4 sm:$0xff]  }
  0xee   :  { %2049 = vmatpush1.bf16.msra.mxu0 %v2877_v26  ;;  %2213 = vmatpush1.bf16.msra.mxu1 %v2880_v27  ;;  %v2969_v26 = vld [vmem:[#allocation6 + $0x7c4] ss:$16 sps:$4 sm:$0xff]   ;;  %v2972_v27 = vld [vmem:[#allocation6 + $0x7cc] ss:$16 sps:$4 sm:$0xff]  }
  0xef   :  { %2059 = vmatprep.subr.bf16.mxu0 %v2885_v28  ;;  %2223 = vmatprep.subr.bf16.mxu1 %v2888_v29  ;;  %v2967_v28 = vld [vmem:[#allocation6 + $0x7c0] ss:$16 sps:$4 sm:$0xff]   ;;  %v2970_v29 = vld [vmem:[#allocation6 + $0x7c8] ss:$16 sps:$4 sm:$0xff]  }
  0xf1   :  { %2051 = vmatmul.mubr.bf16.vlgmr.msra.gmra.mrb[0].mxu0 %v374_v31  ;;  %2215 = vmatmul.mubr.bf16.vlgmr.msra.gmra.mrb[0].mxu1 %v374_v31  ;;  %v2978_v31 = vld [vmem:[#allocation6 + $0x7ec] ss:$16 sps:$4 sm:$0xff]  }
  0xf2   :  { %2060 = vmatpush1.bf16.msra.mxu0 %v2883_v32  ;;  %2224 = vmatpush1.bf16.msra.mxu1 %v2886_v33  ;;  %v2973_v32 = vld [vmem:[#allocation6 + $0x7e0] ss:$16 sps:$4 sm:$0xff]   ;;  %v2976_v33 = vld [vmem:[#allocation6 + $0x7e8] ss:$16 sps:$4 sm:$0xff]  }
  0xf3   :  { %2061 = vmatprep.subr.bf16.mxu0 %v2891_v34  ;;  %2225 = vmatprep.subr.bf16.mxu1 %v2894_v35  ;;  %v376_v34 = vpack.c.bf16 %v3147_v25, %v3147_v25  ;;  %v638_v35 = vsub.s32 0, %v3103_v48 }
  0xf4   :  { %2091 = vmatprep.mubr.bf16.mxu0 %v377_v36  ;;  %2255 = vmatprep.mubr.bf16.mxu1 %v377_v36  ;;  %v646_v36 = vsub.s32 2, %v3103_v48 }
  0xf6   :  { %2062 = vmatpush1.bf16.msra.mxu0 %v2889_v37  ;;  %2226 = vmatpush1.bf16.msra.mxu1 %v2892_v38  ;;  %v634_v37 = vld [vmem:[%s3178_s2] sm:$0xf]  ;;  %v642_v38 = vsub.s32 1, %v3103_v48  ;;  %s3058_s2 = smov [#allocation8]  }
  0xf7   :  { %2063 = vmatprep.subr.bf16.mxu0 %v2897_v39  ;;  %2227 = vmatprep.subr.bf16.mxu1 %v2900_v40  ;;  %v650_v39 = vsub.s32 3, %v3103_v48  ;;  %v639_v40 = vrot.slane %v634_v37, %v638_v35  ;;  %s2293_s13 = sshll.u32 %s3058_s2, 4  ;;  %s2294_s13 = int_to_ptr.vmem [resolvable:$true] %s2293_s13 }
  0xf8   :  { %s3023_s14 = scalar_lea.vmem %s2294_s13, 128  ;;  %p3028_p3 = scmp.lt.s32.totalorder %s2294_s13, %s2294_s13 }
  0xf9   :  { %v651_v25 = vrot.slane %v634_v37, %v650_v39  ;;  %p3024_p2 = scmp.ne.s32.totalorder %s2294_s13, %s3023_s14  ;;  %p3029_p4 = scmp.lt.s32.totalorder %s3023_s14, %s3023_s14 }
  0xfa   :  { %2064 = vmatpush1.bf16.msra.mxu0 %v2895_v41  ;;  %2228 = vmatpush1.bf16.msra.mxu1 %v2898_v42  ;;  %v647_v41 = vrot.slane %v634_v37, %v646_v36  ;;  %v643_v42 = vrot.slane %v634_v37, %v642_v38 }
  0xfb   :  { %2065 = vmatprep.subr.bf16.mxu0 %v2903_v45  ;;  %2229 = vmatprep.subr.bf16.mxu1 %v2906_v46  ;;  %p3030_p5 = por %p3029_p4, %p3028_p3 }
  0xfd   :  { %p3031_p6 = pnand %p3030_p5, %p3024_p2 }
  0xfe   :  { %2066 = vmatpush1.bf16.msra.mxu0 %v2901_v47  ;;  %2230 = vmatpush1.bf16.msra.mxu1 %v2904_v49 }
  0xff   :  { %2067 = vmatprep.subr.bf16.mxu0 %v2909_v50  ;;  %2231 = vmatprep.subr.bf16.mxu1 %v2912_v51 }
 0x102   :  { %2068 = vmatpush1.bf16.msra.mxu0 %v2907_v52  ;;  %2232 = vmatpush1.bf16.msra.mxu1 %v2910_v53 }
 0x103   :  { %2069 = vmatprep.subr.bf16.mxu0 %v2915_v54  ;;  %2233 = vmatprep.subr.bf16.mxu1 %v2918_v55 }
 0x106   :  { %2070 = vmatpush1.bf16.msra.mxu0 %v2913_v56  ;;  %2234 = vmatpush1.bf16.msra.mxu1 %v2916_v57 }
 0x107   :  { %2071 = vmatprep.subr.bf16.mxu0 %v2921_v58  ;;  %2235 = vmatprep.subr.bf16.mxu1 %v2924_v59 }
 0x10a   :  { %2072 = vmatpush1.bf16.msra.mxu0 %v2919_v60  ;;  %2236 = vmatpush1.bf16.msra.mxu1 %v2922_v62 }
 0x10b   :  { %2073 = vmatprep.subr.bf16.mxu0 %v2927_v44  ;;  %2237 = vmatprep.subr.bf16.mxu1 %v2930_v63 }
 0x10e   :  { %2074 = vmatpush1.bf16.msra.mxu0 %v2925_v0  ;;  %2238 = vmatpush1.bf16.msra.mxu1 %v2928_v1 }
 0x10f   :  { %2075 = vmatprep.subr.bf16.mxu0 %v2933_v2  ;;  %2239 = vmatprep.subr.bf16.mxu1 %v2936_v3 }
 0x112   :  { %2076 = vmatpush1.bf16.msra.mxu0 %v2931_v4  ;;  %2240 = vmatpush1.bf16.msra.mxu1 %v2934_v5 }
 0x113   :  { %2077 = vmatprep.subr.bf16.mxu0 %v2939_v6  ;;  %2241 = vmatprep.subr.bf16.mxu1 %v2942_v7 }
 0x116   :  { %2078 = vmatpush1.bf16.msra.mxu0 %v2937_v8  ;;  %2242 = vmatpush1.bf16.msra.mxu1 %v2940_v9 }
 0x117   :  { %2079 = vmatprep.subr.bf16.mxu0 %v2945_v10  ;;  %2243 = vmatprep.subr.bf16.mxu1 %v2948_v11 }
 0x11a   :  { %2080 = vmatpush1.bf16.msra.mxu0 %v2943_v43  ;;  %2244 = vmatpush1.bf16.msra.mxu1 %v2946_v12 }
 0x11b   :  { %2081 = vmatprep.subr.bf16.mxu0 %v2951_v13  ;;  %2245 = vmatprep.subr.bf16.mxu1 %v2954_v14 }
 0x11e   :  { %2082 = vmatpush1.bf16.msra.mxu0 %v2949_v15  ;;  %2246 = vmatpush1.bf16.msra.mxu1 %v2952_v16 }
 0x11f   :  { %2083 = vmatprep.subr.bf16.mxu0 %v2957_v17  ;;  %2247 = vmatprep.subr.bf16.mxu1 %v2960_v18 }
 0x122   :  { %2084 = vmatpush1.bf16.msra.mxu0 %v2955_v19  ;;  %2248 = vmatpush1.bf16.msra.mxu1 %v2958_v20 }
 0x123   :  { %2085 = vmatprep.subr.bf16.mxu0 %v2963_v21  ;;  %2249 = vmatprep.subr.bf16.mxu1 %v2966_v22 }
 0x126   :  { %2086 = vmatpush1.bf16.msra.mxu0 %v2961_v23  ;;  %2250 = vmatpush1.bf16.msra.mxu1 %v2964_v24 }
 0x127   :  { %2087 = vmatprep.subr.bf16.mxu0 %v2969_v26  ;;  %2251 = vmatprep.subr.bf16.mxu1 %v2972_v27 }
 0x12a   :  { %2088 = vmatpush1.bf16.msra.mxu0 %v2967_v28  ;;  %2252 = vmatpush1.bf16.msra.mxu1 %v2970_v29 }
 0x12b   :  { %2089 = vmatprep.subr.bf16.mxu0 %v2975_v30  ;;  %2253 = vmatprep.subr.bf16.mxu1 %v2978_v31 }
 0x12e   :  { %2090 = vmatpush1.bf16.msra.mxu0 %v2973_v32  ;;  %2254 = vmatpush1.bf16.msra.mxu1 %v2976_v33 }
 0x131   :  { %2092 = vmatmul.mubr.bf16.vlgmr.msra.gmra.mrb[0].mxu0 %v376_v34  ;;  %2256 = vmatmul.mubr.bf16.vlgmr.msra.gmra.mrb[0].mxu1 %v376_v34 }
 0x204   :  { %v2093_v45 = vpop.f32.mrb[0].mxu0  ;;  %v2257_v46 = vpop.f32.mrb[0].mxu1 }
 0x205   :  { %v2559_v47 = vadd.f32 %v2093_v45, %v639_v40  ;;  %v2561_v49 = vadd.f32 %v2257_v46, %v647_v41  ;;  %v2095_v50 = vpop.f32.mrb[1].mxu0  ;;  %v2259_v51 = vpop.f32.mrb[1].mxu1 }
 0x206   :  { %v2560_v52 = vadd.f32 %v2095_v50, %v643_v42  ;;  %v2562_v53 = vadd.f32 %v2259_v51, %v651_v25  ;;  %v2097_v54 = vpop.f32.mrb[2].mxu0  ;;  %v2261_v55 = vpop.f32.mrb[2].mxu1 }
 0x207   :  { %v2098_v56 = vpop.f32.mrb[3].mxu0  ;;  %v2262_v57 = vpop.f32.mrb[3].mxu1 }
 0x208   :  { %v2268_v58 = vcombine.low %v2559_v47, %v2560_v52  ;;  %v2269_v59 = vcombine.low %v2561_v49, %v2562_v53 }
 0x20a   :  { %v2276_v48 = vrot.slane %v2268_v58, %v3106_v61  ;;  %v2283_v60 = vrot.slane %v2269_v59, %v3106_v61 }
 0x20c   :  { %v2284_v62 = vcombine.low %v2276_v48, %v2283_v60 }
 0x20e   :  { %2286 = vst [vmem:[#allocation8] sm:$0xff] %v2284_v62 }
 0x20f   :  { %3034 = shalt.err (!%p3031_p6)
}
 0x210   :  { %s3035_s17 = scalar_lea.hbm %s3179_s3, 128 }
 0x211   :  { %p3036_p7 = scmp.ne.s32.totalorder %s3179_s3, %s3035_s17  ;;  %p3039_p8 = scmp.lt.u32.totalorder %s3035_s17, %s3179_s3 }
 0x213   :  { %p3041_p9 = pnand %p3039_p8, %p3036_p7 }
 0x215   :  { %3044 = shalt.err (!%p3041_p9)
}
 0x216   :  { %2296 = dma.vmem_to_hbm [thread:$0]  %s2294_s13, 128, %s3179_s3, [#allocation5]  }
 0x217   :  { %3049 = dma.done.wait [#allocation5], 128  }
 0x218   :  { %3050 = vsyncadd [#allocation5], 4294967168 }
 0x219   :  { %2300 = vsyncpa [#allocation4], 1 }
 0x21a   :  { %2301 = vsyncpa [#allocation7], 1 }
 0x21b   :  { %2302 = vsyncpa [#allocation5], 1 }

</bundles_post_ra>
